<compile_context>
chip_gen: v6e
topology: v6e:2x2x1
jax: 0.10.0
libtpu: 0.0.40
codegen_flags: <defaults>
</compile_context>

<pallas_src>
import functools
import math

import jax
import jax.numpy as jnp
from jax.experimental import pallas as pl
from jax.experimental.pallas import tpu as pltpu


_LANE_SPLIT = 512                      # lanes per core-split block (multiple of 128)
_NUM_SPLITS = 2                        # leading "parallel" grid axis -> 2 TCs on v7x
_ROW_WIDTH = _NUM_SPLITS * _LANE_SPLIT  # 1024-wide flattened slab


def _psnr_partial_kernel(x_ref, y_ref, mx_ref, sse_ref, *,
                         rows_total, tile_rows, acc_rows, ragged):
    """Per-core partial reduction: running elementwise max and sum-of-squared-error.

    Outputs (per core-split c): mx_ref/sse_ref blocks of shape (1, acc_rows, lanes),
    accumulated across the row-block ("arbitrary") grid axis.
    """
    k = pl.program_id(1)

    @pl.when(k == 0)
    def _():
        mx_ref[...] = jnp.full_like(mx_ref, -jnp.inf)
        sse_ref[...] = jnp.zeros_like(sse_ref)

    # Stream native dtype; cast once inside the kernel (mandatory on v5e anyway).
    x = x_ref[...].astype(jnp.float32)
    y = y_ref[...].astype(jnp.float32)
    lanes = x.shape[-1]

    m = jnp.maximum(x, y)
    d = x - y
    sq = d * d

    def _accum(m_v, sq_v):
        if acc_rows == 1:
            # Tiny single-block case (rows not a multiple of 8): one XLU reduce.
            m_f = jnp.max(m_v, axis=0, keepdims=True)[None]
            s_f = jnp.sum(sq_v, axis=0, keepdims=True)[None]
        else:
            # Fold tile into an (1, 8, lanes) vreg-shaped accumulator with pure
            # elementwise (VPU) max/add across vreg groups; the cross-sublane /
            # cross-lane collapse is deferred to the wrapper.
            m_f = jnp.max(m_v.reshape(-1, acc_rows, lanes), axis=0, keepdims=True)
            s_f = jnp.sum(sq_v.reshape(-1, acc_rows, lanes), axis=0, keepdims=True)
        mx_ref[...] = jnp.maximum(mx_ref[...], m_f)
        sse_ref[...] = sse_ref[...] + s_f

    if not ragged:
        _accum(m, sq)
    else:
        is_last = k == pl.num_programs(1) - 1

        @pl.when(jnp.logical_not(is_last))
        def _():
            _accum(m, sq)

        @pl.when(is_last)
        def _():
            # Last row-block is partial: mask out-of-range rows (the padded edge
            # block contains undefined data) before feeding the reductions.
            valid_rows = rows_total - k * tile_rows
            row_id = jax.lax.broadcasted_iota(jnp.int32, m.shape, 0)
            keep = row_id < valid_rows
            _accum(jnp.where(keep, m, -jnp.inf), jnp.where(keep, sq, 0.0))


def psnr_pallas(inputs, targets, *, max_tile_rows=2048):
    """PSNR over two same-shaped tensors (any layout; pure global reduction)."""
    assert inputs.shape == targets.shape
    total = math.prod(inputs.shape)
    assert total > 0

    x = inputs.reshape(-1)
    y = targets.reshape(-1)

    rows = total // _ROW_WIDTH
    bulk = rows * _ROW_WIDTH
    rem = total - bulk

    itemsize = jnp.dtype(inputs.dtype).itemsize
    # Sub-32-bit dtypes pack along sublanes: bf16 needs 16-row, int8/fp8 32-row
    # aligned blocks; f32 needs 8.
    row_align = max(8, 32 // max(1, itemsize))

    if rows == 0:
        # Tiny input (< 1024 elements): no bulk slab for the kernel; plain jnp.
        xf = x.astype(jnp.float32)
        yf = y.astype(jnp.float32)
        mx = jnp.max(jnp.maximum(xf, yf))
        sse = jnp.sum(jnp.square(xf - yf))
    else:
        xb = x if rem == 0 else x[:bulk]
        yb = y if rem == 0 else y[:bulk]
        x2d = xb.reshape(rows, _ROW_WIDTH)
        y2d = yb.reshape(rows, _ROW_WIDTH)

        max_tr = max(row_align, (max_tile_rows // row_align) * row_align)
        if rows <= max_tr:
            tile_rows = rows          # single row-block == full dim -> always legal
        else:
            tile_rows = max_tr        # aligned tile; ragged tail masked in-kernel
        blocks = pl.cdiv(rows, tile_rows)
        ragged = (rows % tile_rows) != 0
        acc_rows = 8 if tile_rows % 8 == 0 else 1

        kernel = functools.partial(
            _psnr_partial_kernel,
            rows_total=rows, tile_rows=tile_rows, acc_rows=acc_rows, ragged=ragged)

        part_shape = jax.ShapeDtypeStruct((_NUM_SPLITS, acc_rows, _LANE_SPLIT),
                                          jnp.float32)

        mx_p, sse_p = pl.pallas_call(
            kernel,
            out_shape=(part_shape, part_shape),
            grid=(_NUM_SPLITS, blocks),
            in_specs=[
                pl.BlockSpec((tile_rows, _LANE_SPLIT), lambda c, k: (k, c)),
                pl.BlockSpec((tile_rows, _LANE_SPLIT), lambda c, k: (k, c)),
            ],
            out_specs=(
                pl.BlockSpec((1, acc_rows, _LANE_SPLIT), lambda c, k: (c, 0, 0)),
                pl.BlockSpec((1, acc_rows, _LANE_SPLIT), lambda c, k: (c, 0, 0)),
            ),
            compiler_params=pltpu.CompilerParams(
                dimension_semantics=("parallel", "arbitrary"),
                vmem_limit_bytes=48 * 1024 * 1024,
            ),
            cost_estimate=pl.CostEstimate(
                flops=5 * bulk,
                transcendentals=0,
                bytes_accessed=2 * bulk * itemsize
                + 2 * _NUM_SPLITS * acc_rows * _LANE_SPLIT * 4,
            ),
        )(x2d, y2d)

        mx = jnp.max(mx_p)
        sse = jnp.sum(sse_p)

        if rem:
            # Fold the < 1024-element remainder with plain jnp (negligible).
            xt = x[bulk:].astype(jnp.float32)
            yt = y[bulk:].astype(jnp.float32)
            mx = jnp.maximum(mx, jnp.max(jnp.maximum(xt, yt)))
            sse = sse + jnp.sum(jnp.square(xt - yt))

    mse = sse / jnp.float32(total)
    # Note: mse == 0 (identical inputs) -> inf, same as the torch reference.
    return 10.0 * jnp.log10((mx * mx) / mse)


def psnr_ref(inputs, targets):
    mx = jnp.maximum(jnp.max(inputs), jnp.max(targets))
    mse = jnp.mean(jnp.square(inputs - targets))
    return 10.0 * jnp.log10(mx**2 / mse)


if __name__ == "__main__":
    key = jax.random.PRNGKey(0)
    k1, k2, k3, k4, k5, k6, k7, k8 = jax.random.split(key, 8)

    # 1) Small NCHW (2,4,16,16): single row-block (rows=2), no remainder.
    x = jax.random.uniform(k1, (2, 4, 16, 16), dtype=jnp.float32)
    y = x + 0.05 * jax.random.normal(k2, (2, 4, 16, 16), dtype=jnp.float32)
    out = psnr_pallas(x, y)
    jax.block_until_ready(out)
    ref = psnr_ref(x, y)
    assert jnp.allclose(out, ref, rtol=1e-4, atol=1e-4), (out, ref)

    # 2) Multi-block running accumulation + in-kernel ragged-tail masking:
    #    rows=20, forced tile_rows=8 -> 3 row-blocks, last block masked.
    x2 = jax.random.uniform(k3, (2, 4, 40, 64), dtype=jnp.float32)
    y2 = x2 + 0.05 * jax.random.normal(k4, (2, 4, 40, 64), dtype=jnp.float32)
    out2 = psnr_pallas(x2, y2, max_tile_rows=8)
    jax.block_until_ready(out2)
    ref2 = psnr_ref(x2, y2)
    assert jnp.allclose(out2, ref2, rtol=1e-4, atol=1e-4), (out2, ref2)

    # 3) Total not a multiple of 1024: bulk through the kernel, 128-element
    #    remainder folded in the wrapper (no concatenate / padding copies).
    x3 = jax.random.uniform(k5, (2, 4, 17, 16), dtype=jnp.float32)
    y3 = x3 + 0.05 * jax.random.normal(k6, (2, 4, 17, 16), dtype=jnp.float32)
    out3 = psnr_pallas(x3, y3)
    jax.block_until_ready(out3)
    ref3 = psnr_ref(x3, y3)
    assert jnp.allclose(out3, ref3, rtol=1e-4, atol=1e-4), (out3, ref3)

    # 4) bf16 native-dtype streaming (16-row aligned blocks, in-kernel f32 cast).
    x4f = jax.random.uniform(k7, (2, 4, 64, 32), dtype=jnp.float32)
    y4f = x4f + 0.05 * jax.random.normal(k8, (2, 4, 64, 32), dtype=jnp.float32)
    x4 = x4f.astype(jnp.bfloat16)
    y4 = y4f.astype(jnp.bfloat16)
    out4 = psnr_pallas(x4, y4)
    jax.block_until_ready(out4)
    ref4 = psnr_ref(x4.astype(jnp.float32), y4.astype(jnp.float32))
    assert jnp.allclose(out4, ref4, rtol=1e-3, atol=1e-3), (out4, ref4)

    print("KERNEL_OK")
</pallas_src>

<mosaic_0001>
module attributes {stable_mosaic.version = 11 : i64} {
  func.func @_psnr_partial_kernel(%arg0: i32, %arg1: i32, %arg2: memref<2x512xf32, #tpu.memory_space<vmem>>, %arg3: memref<2x512xf32, #tpu.memory_space<vmem>>, %arg4: memref<1x1x512xf32, #tpu.memory_space<vmem>>, %arg5: memref<1x1x512xf32, #tpu.memory_space<vmem>>) attributes {dimension_semantics = [#tpu.dimension_semantics<parallel>, #tpu.dimension_semantics<arbitrary>], iteration_bounds = array<i64: 2, 1>, scalar_prefetch = 0 : i64, scratch_operands = 0 : i64, tpu.core_type = #tpu.core_type<tc>, window_params = [{transform_indices = @transform_0, window_bounds = array<i64: 2, 512>}, {transform_indices = @transform_1, window_bounds = array<i64: 2, 512>}, {transform_indices = @transform_2, window_bounds = array<i64: 1, 1, 512>}, {transform_indices = @transform_3, window_bounds = array<i64: 1, 1, 512>}]} {
    %c0_i32 = arith.constant 0 : i32
    %0 = arith.cmpi eq, %arg1, %c0_i32 : i32
    %1 = arith.extui %0 : i1 to i32
    %c0_i32_0 = arith.constant 0 : i32
    %2 = arith.cmpi ne, %1, %c0_i32_0 : i32
    scf.if %2 {
      %cst_17 = arith.constant 0xFF800000 : f32
      %20 = vector.broadcast %cst_17 : f32 to vector<1x1x512xf32>
      %c0_18 = arith.constant 0 : index
      %c0_19 = arith.constant 0 : index
      %c0_20 = arith.constant 0 : index
      %21 = vector.load %arg4[%c0_18, %c0_19, %c0_20] : memref<1x1x512xf32, #tpu.memory_space<vmem>>, vector<1x1x512xf32>
      tpu.vector_store %arg4[%c0_18, %c0_19, %c0_20], %20 {strides = array<i32>} : memref<1x1x512xf32, #tpu.memory_space<vmem>>, vector<1x1x512xf32>,
      %cst_21 = arith.constant 0.000000e+00 : f32
      %22 = vector.broadcast %cst_21 : f32 to vector<1x1x512xf32>
      %c0_22 = arith.constant 0 : index
      %c0_23 = arith.constant 0 : index
      %c0_24 = arith.constant 0 : index
      %23 = vector.load %arg5[%c0_22, %c0_23, %c0_24] : memref<1x1x512xf32, #tpu.memory_space<vmem>>, vector<1x1x512xf32>
      tpu.vector_store %arg5[%c0_22, %c0_23, %c0_24], %22 {strides = array<i32>} : memref<1x1x512xf32, #tpu.memory_space<vmem>>, vector<1x1x512xf32>,
    } else {
    }
    %c0 = arith.constant 0 : index
    %c0_1 = arith.constant 0 : index
    %3 = vector.load %arg2[%c0, %c0_1] : memref<2x512xf32, #tpu.memory_space<vmem>>, vector<2x512xf32>
    %c0_2 = arith.constant 0 : index
    %c0_3 = arith.constant 0 : index
    %4 = vector.load %arg3[%c0_2, %c0_3] : memref<2x512xf32, #tpu.memory_space<vmem>>, vector<2x512xf32>
    %5 = arith.maximumf %3, %4 : vector<2x512xf32>
    %6 = arith.subf %3, %4 : vector<2x512xf32>
    %7 = arith.mulf %6, %6 : vector<2x512xf32>
    %cst = arith.constant dense<0xFF800000> : vector<512xf32>
    %8 = vector.multi_reduction <maximumf>, %5, %cst [0] : vector<2x512xf32> to vector<512xf32>
    %9 = vector.shape_cast %8 : vector<512xf32> to vector<1x512xf32>
    %10 = vector.shape_cast %9 : vector<1x512xf32> to vector<1x1x512xf32>
    %cst_4 = arith.constant dense<0.000000e+00> : vector<512xf32>
    %11 = vector.multi_reduction <add>, %7, %cst_4 [0] : vector<2x512xf32> to vector<512xf32>
    %12 = vector.shape_cast %11 : vector<512xf32> to vector<1x512xf32>
    %13 = vector.shape_cast %12 : vector<1x512xf32> to vector<1x1x512xf32>
    %c0_5 = arith.constant 0 : index
    %c0_6 = arith.constant 0 : index
    %c0_7 = arith.constant 0 : index
    %14 = vector.load %arg4[%c0_5, %c0_6, %c0_7] : memref<1x1x512xf32, #tpu.memory_space<vmem>>, vector<1x1x512xf32>
    %15 = arith.maximumf %14, %10 : vector<1x1x512xf32>
    %c0_8 = arith.constant 0 : index
    %c0_9 = arith.constant 0 : index
    %c0_10 = arith.constant 0 : index
    %16 = vector.load %arg4[%c0_8, %c0_9, %c0_10] : memref<1x1x512xf32, #tpu.memory_space<vmem>>, vector<1x1x512xf32>
    tpu.vector_store %arg4[%c0_8, %c0_9, %c0_10], %15 {strides = array<i32>} : memref<1x1x512xf32, #tpu.memory_space<vmem>>, vector<1x1x512xf32>,
    %c0_11 = arith.constant 0 : index
    %c0_12 = arith.constant 0 : index
    %c0_13 = arith.constant 0 : index
    %17 = vector.load %arg5[%c0_11, %c0_12, %c0_13] : memref<1x1x512xf32, #tpu.memory_space<vmem>>, vector<1x1x512xf32>
    %18 = arith.addf %17, %13 : vector<1x1x512xf32>
    %c0_14 = arith.constant 0 : index
    %c0_15 = arith.constant 0 : index
    %c0_16 = arith.constant 0 : index
    %19 = vector.load %arg5[%c0_14, %c0_15, %c0_16] : memref<1x1x512xf32, #tpu.memory_space<vmem>>, vector<1x1x512xf32>
    tpu.vector_store %arg5[%c0_14, %c0_15, %c0_16], %18 {strides = array<i32>} : memref<1x1x512xf32, #tpu.memory_space<vmem>>, vector<1x1x512xf32>,
    return
  }
  func.func @transform_0(%arg0: i32, %arg1: i32) -> (i32, i32) {
    %c0_i32 = arith.constant 0 : i32
    return %arg1, %arg0 : i32, i32
  }
  func.func @transform_1(%arg0: i32, %arg1: i32) -> (i32, i32) {
    %c0_i32 = arith.constant 0 : i32
    return %arg1, %arg0 : i32, i32
  }
  func.func @transform_2(%arg0: i32, %arg1: i32) -> (i32, i32, i32) {
    %c0_i32 = arith.constant 0 : i32
    %c0_i32_0 = arith.constant 0 : i32
    %c0_i32_1 = arith.constant 0 : i32
    return %arg0, %c0_i32, %c0_i32_0 : i32, i32, i32
  }
  func.func @transform_3(%arg0: i32, %arg1: i32) -> (i32, i32, i32) {
    %c0_i32 = arith.constant 0 : i32
    %c0_i32_0 = arith.constant 0 : i32
    %c0_i32_1 = arith.constant 0 : i32
    return %arg0, %c0_i32, %c0_i32_0 : i32, i32, i32
  }
}

</mosaic_0001>

<bundles_post_ra>
// kernel: tpu_custom_call.1
= control target key start
LH: loop header
LB: loop body
LE: loop exit
PB: predicated region body
PF: predicated region fallthrough
CT: control target
= control target key end

     0   :  { %9 = vsyncpa [#allocation3], 0  ;;  %s1156_s0 = inlined_call_operand.hbm [shape: f32[2,1024], index: 0, kind: input, shape index: {}]   ;;  %s1157_s1 = inlined_call_operand.hbm [shape: f32[2,1024], index: 1, kind: input, shape index: {}]   ;;  %s1158_s2 = inlined_call_operand.hbm [shape: f32[2,1,512], index: 2, kind: output, shape index: {0}]   ;;  %s1159_s3 = inlined_call_operand.hbm [shape: f32[2,1,512], index: 3, kind: output, shape index: {1}]  }
   0x1   :  { %11 = vsyncpa [#allocation3 + $0x1], 0 }
   0x2   :  { %12 = vsyncpa [#allocation6], 0 }
   0x3   :  { %14 = vsyncpa [#allocation6 + $0x1], 0 }
   0x4   :  { %15 = vsyncpa [#allocation4], 0 }
   0x5   :  { %17 = vsyncpa [#allocation4 + $0x1], 0 }
   0x6   :  { %18 = vsyncpa [#allocation9], 0 }
   0x7   :  { %20 = vsyncpa [#allocation9 + $0x1], 0  ;;  %s918_s12 = smov 0   ;;  %s920_s13 = smov 0  }
   0x8   :  { %s922_s14 = smov 0   ;;  %s924_s15 = smov 0  }
   0x9   :  { %s926_s16 = smov 0   ;;  %s928_s17 = smov 0  }
   0xa LB: > { %s615_s18 = sadd.s32 4294967295, %s888_s17   ;;  %s616_s19 = sadd.s32 4294967294, %s888_s17   ;;  %s888_s17 = sphi %s928_s17, %s26_s17   ;;  %s884_s16 = sphi %s926_s16, %s1173_s16   ;;  %s880_s15 = sphi %s924_s15, %s1172_s15   ;;  %s876_s14 = sphi %s922_s14, %s1171_s14   ;;  %s872_s13 = sphi %s920_s13, %s1170_s13   ;;  %s868_s12 = sphi %s918_s12, %s1169_s12  }
   0xb   : > { %s38_s20 = sadd.s32 1, %s884_s16  ;;  %s47_s21 = sadd.s32 1, %s876_s14 }
   0xc   : > { %p40_p0 = scmp.ge.s32.totalorder %s38_s20, 2  ;;  %p54_p1 = scmp.ne.s32.totalorder %s876_s14, %s872_s13 }
   0xd   : > { %p55_p2 = scmp.eq.s32.totalorder %s888_s17, 0  ;;  %p60_p3 = scmp.ne.s32.totalorder %s872_s13, %s868_s12 }
   0xe   : > { %s1175_s20 = smov (%p40_p0, %s38_s20), 0  ;;  %p61_p5 = scmp.eq.s32.totalorder %s615_s18, 0 }
   0xf   : > { %p959_p4 = por %p55_p2, %p54_p1  ;;  %s43_s23 = ssub.s32 %s884_s16, %s1175_s20 }
  0x10   : > { %p112_p6 = scmp.eq.s32.totalorder %s615_s18, 1  ;;  %p45_p7 = scmp.eq.s32.totalorder %s43_s23, 0 }
  0x11   : > { %p965_p8 = por %p61_p5, %p60_p3  ;;  %p118_p10 = scmp.eq.s32.totalorder %s616_s19, 1 }
  0x12   : > { %p969_p9 = por %p112_p6, %p54_p1  ;;  %p664_p13 = scmp.lt.s32.totalorder %s888_s17, 2 }
  0x13   : > { %s974_s26 = scalar_select %p45_p7, %s876_s14, %s47_s21  }
  0x14   : > { %p976_p11 = por %p118_p10, %p60_p3  ;;  %s983_s28 = sand.u32 1, %s876_s14  }
  0x15   : > { %s619_s29 = sshll.u32 %s983_s28, 3  ;;  %s638_s30 = sshll.u32 %s884_s16, 7 }
  0x16   : > { %s176_s6 = scalar_lea.hbm %s1156_s0, %s638_s30  ;;  %s168_s7 = scalar_lea.vmem [#allocation2], %s619_s29 }
  0x17   : > { %s178_s8 = sshll.u32 %s168_s7, 4  ;;  %p992_p0 = pnand %p664_p13, %p959_p4  ;;  %s179_s8 = int_to_ptr.vmem [resolvable:$true] %s178_s8 }
  0x18   : > { %p625_p1 = scmp.ge.s32.totalorder %s888_s17, 1  ;;  %p204_p2 = scmp.lt.s32.totalorder %s888_s17, 3 }
  0x19   : > { %s165_s10 = scalar_lea.sflag [#allocation3], %s983_s28  ;;  %p720_p3 = pneg %p992_p0 }
  0x1a   : > { %s731_s11 = scalar_lea.vmem %s179_s8, 128  ;;  %s890_s18 = smov [#allocation2]  }
  0x1b   : > { %p732_p5 = scmp.ne.s32.totalorder %s179_s8, %s731_s11  ;;  %s736_s19 = sshll.u32 %s890_s18, 4  ;;  %s737_s19 = int_to_ptr.vmem [resolvable:$false] %s736_s19 }
  0x1c   : > { %s738_s21 = scalar_lea.vmem %s737_s19, 256  ;;  %p739_p4 = scmp.lt.s32.totalorder %s179_s8, %s737_s19 }
  0x1d   : > { %p734_p6 = pnand %p732_p5, %p720_p3  ;;  %p740_p10 = scmp.lt.s32.totalorder %s738_s21, %s731_s11 }
  0x1f   : > { %p735_p7 = pneg %p734_p6  ;;  %p741_p13 = por %p740_p10, %p739_p4 }
  0x21   : > { %p742_p12 = pnand %p741_p13, %p735_p7 }
  0x23   : > { %745 = shalt.err (!%p742_p12)
}
  0x24   : > { %653 = dma.hbm_to_vmem [thread:$0]  (!%p992_p0), %s176_s6, 128, %s179_s8, %s165_s10  }
  0x25   : > { %p1010_p5 = pnand %p625_p1, %p204_p2  ;;  %s197_s5 = scalar_lea.hbm %s1157_s1, %s638_s30 }
  0x26   : > { %s189_s7 = scalar_lea.vmem [#allocation5], %s619_s29  ;;  %s186_s18 = scalar_lea.sflag [#allocation6], %s983_s28 }
  0x27   : > { %s199_s11 = sshll.u32 %s189_s7, 4  ;;  %s891_s6 = smov [#allocation5]   ;;  %s200_s11 = int_to_ptr.vmem [resolvable:$true] %s199_s11 }
  0x28   : > { %s759_s19 = scalar_lea.vmem %s200_s11, 128  ;;  %s764_s8 = sshll.u32 %s891_s6, 4  ;;  %s765_s8 = int_to_ptr.vmem [resolvable:$false] %s764_s8 }
  0x29   : > { %p760_p12 = scmp.ne.s32.totalorder %s200_s11, %s759_s19  ;;  %s766_s10 = scalar_lea.vmem %s765_s8, 256 }
  0x2a   : > { %p767_p1 = scmp.lt.s32.totalorder %s200_s11, %s765_s8  ;;  %p768_p2 = scmp.lt.s32.totalorder %s766_s10, %s759_s19 }
  0x2b   : > { %p762_p6 = pnand %p760_p12, %p720_p3 }
  0x2c   : > { %p769_p4 = por %p768_p2, %p767_p1 }
  0x2d   : > { %p763_p7 = pneg %p762_p6 }
  0x2f   : > { %p770_p10 = pnand %p769_p4, %p763_p7 }
  0x31   : > { %773 = shalt.err (!%p770_p10)
}
  0x32   : > { %656 = dma.hbm_to_vmem [thread:$0]  (!%p992_p0), %s197_s5, 128, %s200_s11, %s186_s18  }
  0x33   : > { %208 = sbr.rel (%p1010_p5) target bundleno = 129 (0x81), region = 28  ;;  %s1026_s28 = sand.u32 (!%p1010_p5), 1, %s872_s13  }
  0x34   : > { %s626_s29 = sshll.u32 (!%p1010_p5), %s1026_s28, 3  ;;  %s211_s30 = scalar_lea.sflag (!%p1010_p5), [#allocation3], %s1026_s28 }
  0x35   : > { %s214_s21 = scalar_lea.vmem (!%p1010_p5), [#allocation2], %s626_s29 }
  0x38   : > { %851 = dma.done.wait (%p965_p8), %s211_s30, 128  }
  0x39   : > { %853 = vsyncadd (%p965_p8), %s211_s30, 4294967168  ;;  %s220_s9 = scalar_lea.sflag [#allocation6], %s1026_s28  ;;  %s223_s23 = scalar_lea.vmem [#allocation5], %s626_s29 }
  0x3a   : > { %855 = dma.done.wait (%p965_p8), %s220_s9, 128  }
  0x3b   : > { %857 = vsyncadd (%p965_p8), %s220_s9, 4294967168  ;;  %s628_s22 = sshll.u32 %s1026_s28, 2  ;;  %v262_v0 = vlaneseq  ;;  %v892_v1 = vmov 1983009808   ;;  %v893_v5 = vmov -inf   ;;  %v894_v7 = vmov 0.0  }
  0x3c   : > { %v276_v2 = vunpack.c.l.s4 %v892_v1  ;;  %s1046_s4 = scalar_lea.vmem [#allocation7], %s628_s22  ;;  %s1051_s24 = scalar_lea.vmem [#allocation8], %s628_s22  ;;  %v268_v9 = vld [vmem:[%s214_s21] sm:$0xff]  ;;  %v269_v10 = vld [vmem:[%s223_s23] sm:$0xff]  ;;  %vm295_vm1 = vcmask 1041408  }
  0x3d   : > { %vm1040_vm0 = vcmp.lt.s32.totalorder %v262_v0, 512  ;;  %v1044_v4 = vshrl.u32 %v262_v0, 7  ;;  %v270_v11 = vmax.f32 %v268_v9, %v269_v10  ;;  %v271_v12 = vsub.f32 %v268_v9, %v269_v10  ;;  %s640_s5 = sshll.u32 %s880_s15, 6  ;;  %s462_s7 = sshll.u32 %s1046_s4, 4  ;;  %s1076_s7 = int_to_ptr.vmem [resolvable:$true] %s462_s7 }
  0x3e   : > { %266 = vst.msk [vmem:[%s1046_s4] sm:$0xf] %vm1040_vm0, %v893_v5  ;;  %v277_v6 = vunpack.c.0.s8 %v276_v2  ;;  %267 = vst.msk [vmem:[%s1051_s24] sm:$0xf] %vm1040_vm0, %v894_v7  ;;  %v895_v13 = vmov 1966171168   ;;  %s1074_s6 = scalar_lea.hbm %s1158_s2, %s640_s5  ;;  %s1084_s10 = scalar_lea.hbm %s1159_s3, %s640_s5 }
  0x3f   : > { %v382_v14 = vunpack.c.l.s4 %v895_v13  ;;  %v272_v15 = vmul.f32 %v271_v12, %v271_v12  ;;  %v274_v16 = vcombine.high %v270_v11, %v270_v11  ;;  %s476_s11 = sshll.u32 %s1051_s24, 4  ;;  %s443_s29 = scalar_lea.sflag [#allocation4], %s1026_s28  ;;  %s1086_s11 = int_to_ptr.vmem [resolvable:$true] %s476_s11 }
  0x40   : > { %v280_v8 = vsub.s32 %v277_v6, %v1044_v4  ;;  %s774_s30 = scalar_lea.vmem %s1076_s7, 64  ;;  %s896_s21 = smov [#allocation7]  }
  0x41   : > { %v325_v21 = vcombine.high %v272_v15, %v272_v15  ;;  %v383_v24 = vunpack.c.0.s8 %v382_v14  ;;  %p775_p8 = scmp.ne.s32.totalorder %s1076_s7, %s774_s30  ;;  %s778_s9 = sshll.u32 %s896_s21, 4  ;;  %s779_s9 = int_to_ptr.vmem [resolvable:$false] %s778_s9 }
  0x42   : > { %v281_v17 = vrot.slane %v270_v11, %v280_v8  ;;  %v288_v18 = vrot.slane %v274_v16, %v280_v8  ;;  %v332_v23 = vrot.slane %v272_v15, %v280_v8  ;;  %s780_s23 = scalar_lea.vmem %s779_s9, 128  ;;  %p781_p13 = scmp.lt.s32.totalorder %s1076_s7, %s779_s9 }
  0x43   : > { %v339_v28 = vrot.slane %v325_v21, %v280_v8  ;;  %v386_v10 = vsub.s32 %v383_v24, %v1044_v4  ;;  %p776_p0 = pnand %p775_p8, %p969_p9  ;;  %p782_p5 = scmp.lt.s32.totalorder %s780_s23, %s774_s30 }
  0x44   : > { %v289_v19 = vcombine.high %v281_v17, %v281_v17  ;;  %v296_v20 = vsel %vm295_vm1, %v281_v17, -inf  ;;  %v290_v25 = vcombine.high %v288_v18, %v288_v18  ;;  %v310_v27 = vsel %vm295_vm1, %v288_v18, -inf }
  0x45   : > { %v297_v22 = vrot.slane %v296_v20, 4  ;;  %v311_v31 = vrot.slane %v310_v27, 4  ;;  %v340_v32 = vcombine.high %v332_v23, %v332_v23  ;;  %v341_v34 = vcombine.high %v339_v28, %v339_v28  ;;  %p777_p3 = pneg %p776_p0  ;;  %p783_p12 = por %p782_p5, %p781_p13 }
  0x46   : > { %v303_v26 = vsel %vm295_vm1, %v289_v19, -inf  ;;  %v317_v33 = vsel %vm295_vm1, %v290_v25, -inf  ;;  %v346_v35 = vsel %vm295_vm1, %v332_v23, 0.0  ;;  %v360_v36 = vsel %vm295_vm1, %v339_v28, 0.0  ;;  %v374_v28 = vld [vmem:[%s1046_s4] sm:$0xf] }
  0x47   : > { %v298_v29 = vmax.f32 %v296_v20, %v297_v22  ;;  %v304_v30 = vrot.slane %v303_v26, 4  ;;  %v312_v39 = vmax.f32 %v310_v27, %v311_v31  ;;  %v318_v40 = vrot.slane %v317_v33, 4  ;;  %p784_p6 = pnand %p783_p12, %p777_p3 }
  0x48   : > { %v347_v41 = vrot.slane %v346_v35, 4  ;;  %v353_v42 = vsel %vm295_vm1, %v340_v32, 0.0  ;;  %v361_v43 = vrot.slane %v360_v36, 4  ;;  %v367_v44 = vsel %vm295_vm1, %v341_v34, 0.0  ;;  %v410_v34 = vld [vmem:[%s1051_s24] sm:$0xf] }
  0x49   : > { %v299_v37 = vrot.slane %v298_v29, 2  ;;  %v305_v38 = vmax.f32 %v303_v26, %v304_v30  ;;  %v313_v47 = vrot.slane %v312_v39, 2  ;;  %v319_v48 = vmax.f32 %v317_v33, %v318_v40 }
  0x4a   : > { %v348_v49 = vadd.f32 %v347_v41, %v346_v35  ;;  %v354_v50 = vrot.slane %v353_v42, 4  ;;  %v362_v51 = vadd.f32 %v361_v43, %v360_v36  ;;  %v368_v52 = vrot.slane %v367_v44, 4 }
  0x4b   : > { %v300_v45 = vmax.f32 %v298_v29, %v299_v37  ;;  %v306_v46 = vrot.slane %v305_v38, 2  ;;  %v314_v55 = vmax.f32 %v312_v39, %v313_v47  ;;  %v320_v56 = vrot.slane %v319_v48, 2 }
  0x4c   : > { %v349_v57 = vrot.slane %v348_v49, 2  ;;  %v355_v58 = vadd.f32 %v354_v50, %v353_v42  ;;  %v363_v59 = vrot.slane %v362_v51, 2  ;;  %v369_v60 = vadd.f32 %v368_v52, %v367_v44 }
  0x4d   : > { %v301_v53 = vrot.slane %v300_v45, 1  ;;  %v307_v54 = vmax.f32 %v305_v38, %v306_v46  ;;  %v315_v63 = vrot.slane %v314_v55, 1  ;;  %v321_v0 = vmax.f32 %v319_v48, %v320_v56 }
  0x4e   : > { %v350_v1 = vadd.f32 %v349_v57, %v348_v49  ;;  %v356_v2 = vrot.slane %v355_v58, 2  ;;  %v364_v5 = vadd.f32 %v363_v59, %v362_v51  ;;  %v370_v6 = vrot.slane %v369_v60, 2 }
  0x4f   : > { %v302_v61 = vmax.f32 %v300_v45, %v301_v53  ;;  %v308_v62 = vrot.slane %v307_v54, 1  ;;  %v316_v8 = vmax.f32 %v314_v55, %v315_v63  ;;  %v322_v9 = vrot.slane %v321_v0, 1 }
  0x50   : > { %v351_v11 = vrot.slane %v350_v1, 1  ;;  %v357_v12 = vadd.f32 %v356_v2, %v355_v58  ;;  %v365_v13 = vrot.slane %v364_v5, 1  ;;  %v371_v14 = vadd.f32 %v370_v6, %v369_v60 }
  0x51   : > { %v309_v7 = vmax.f32 %v307_v54, %v308_v62  ;;  %v323_v15 = vmax.f32 %v321_v0, %v322_v9 }
  0x52   : > { %v352_v17 = vadd.f32 %v351_v11, %v350_v1  ;;  %v358_v18 = vrot.slane %v357_v12, 1  ;;  %v366_v19 = vadd.f32 %v365_v13, %v364_v5  ;;  %v372_v20 = vrot.slane %v371_v14, 1 }
  0x53   : > { %v379_v16 = vcombine.low %v302_v61, %v309_v7  ;;  %v380_v21 = vcombine.low %v316_v8, %v323_v15 }
  0x54   : > { %v359_v23 = vadd.f32 %v358_v18, %v357_v12  ;;  %v373_v25 = vadd.f32 %v372_v20, %v371_v14 }
  0x55   : > { %v387_v22 = vrot.slane %v379_v16, %v386_v10  ;;  %v394_v4 = vrot.slane %v380_v21, %v386_v10 }
  0x56   : > { %v415_v24 = vcombine.low %v352_v17, %v359_v23  ;;  %v416_v26 = vcombine.low %v366_v19, %v373_v25 }
  0x57   : > { %v395_v27 = vcombine.low %v387_v22, %v394_v4 }
  0x58   : > { %v423_v29 = vrot.slane %v415_v24, %v386_v10  ;;  %v430_v30 = vrot.slane %v416_v26, %v386_v10 }
  0x59   : > { %v402_v31 = vrot.slane %v395_v27, %v386_v10 }
  0x5a   : > { %v431_v32 = vcombine.low %v423_v29, %v430_v30 }
  0x5b   : > { %v404_v33 = vmax.f32 %v374_v28, %v402_v31 }
  0x5c   : > { %v438_v35 = vrot.slane %v431_v32, %v386_v10 }
  0x5d   : > { %409 = vst.msk [vmem:[%s1046_s4] sm:$0xf] %vm1040_vm0, %v404_v33 }
  0x5e   : > { %v440_v36 = vadd.f32 %v438_v35, %v410_v34 }
  0x5f   : > { %787 = shalt.err (!%p784_p6)
}
  0x60   : > { %s788_s22 = scalar_lea.hbm %s1074_s6, 64  ;;  %s792_s18 = scalar_lea.hbm %s1158_s2, 128 }
  0x61   : > { %p789_p7 = scmp.ne.s32.totalorder %s1074_s6, %s788_s22  ;;  %p793_p4 = scmp.lt.s32.totalorder %s1074_s6, %s1158_s2 }
  0x62   : > { %p794_p10 = scmp.lt.s32.totalorder %s792_s18, %s788_s22 }
  0x63   : > { %p790_p1 = pnand %p789_p7, %p969_p9 }
  0x64   : > { %p795_p8 = por %p794_p10, %p793_p4 }
  0x65   : > { %p791_p2 = pneg %p790_p1 }
  0x67   : > { %p796_p0 = pnand %p795_p8, %p791_p2 }
  0x69   : > { %799 = shalt.err (!%p796_p0)
}
  0x6a   : > { %646 = dma.vmem_to_hbm [thread:$0]  (%p969_p9), %s1076_s7, 64, %s1074_s6, %s443_s29   ;;  %441 = vst.msk [vmem:[%s1051_s24] sm:$0xf] %vm1040_vm0, %v440_v36 }
  0x6b   : > { %s448_s8 = scalar_lea.sflag [#allocation9], %s1026_s28  ;;  %s800_s30 = scalar_lea.vmem %s1086_s11, 64 }
  0x6c   : > { %p801_p3 = scmp.ne.s32.totalorder %s1086_s11, %s800_s30  ;;  %s897_s21 = smov [#allocation8]  }
  0x6d   : > { %s804_s9 = sshll.u32 %s897_s21, 4  ;;  %s805_s9 = int_to_ptr.vmem [resolvable:$false] %s804_s9 }
  0x6e   : > { %p802_p13 = pnand %p801_p3, %p969_p9  ;;  %s806_s23 = scalar_lea.vmem %s805_s9, 128 }
  0x6f   : > { %p807_p12 = scmp.lt.s32.totalorder %s1086_s11, %s805_s9  ;;  %p808_p6 = scmp.lt.s32.totalorder %s806_s23, %s800_s30 }
  0x70   : > { %p803_p5 = pneg %p802_p13 }
  0x71   : > { %p809_p7 = por %p808_p6, %p807_p12 }
  0x73   : > { %p810_p1 = pnand %p809_p7, %p803_p5 }
  0x75   : > { %813 = shalt.err (!%p810_p1)
}
  0x76   : > { %s814_s24 = scalar_lea.hbm %s1084_s10, 64  ;;  %s818_s6 = scalar_lea.hbm %s1159_s3, 128 }
  0x77   : > { %p815_p2 = scmp.ne.s32.totalorder %s1084_s10, %s814_s24  ;;  %p819_p8 = scmp.lt.s32.totalorder %s1084_s10, %s1159_s3 }
  0x78   : > { %p820_p0 = scmp.lt.s32.totalorder %s818_s6, %s814_s24 }
  0x79   : > { %p816_p4 = pnand %p815_p2, %p969_p9 }
  0x7a   : > { %p821_p3 = por %p820_p0, %p819_p8 }
  0x7b   : > { %p817_p10 = pneg %p816_p4 }
  0x7d   : > { %p822_p13 = pnand %p821_p3, %p817_p10 }
  0x7f   : > { %825 = shalt.err (!%p822_p13)
}
  0x80   : > { %647 = dma.vmem_to_hbm [thread:$0]  (%p969_p9), %s1086_s11, 64, %s1084_s10, %s448_s8  }
  0x81 PF: > { %s488_s4 = sand.u32 1, %s868_s12   ;;  %p1168_p5 = scmp.ge.s32.totalorder %s888_s17, 2 }
  0x82   : > { %s489_s5 = scalar_lea.sflag [#allocation4], %s488_s4 }
  0x83   : > { %p658_p12 = pnand %p1168_p5, %p976_p11 }
  0x85   : > { %p659_p6 = pneg %p658_p12 }
  0x87   : > { %859 = dma.done.wait (%p659_p6), %s489_s5, 64  }
  0x88   : > { %861 = vsyncadd (%p659_p6), %s489_s5, 4294967232  ;;  %s498_s18 = scalar_lea.sflag [#allocation9], %s488_s4 }
  0x89   : > { %863 = dma.done.wait (%p659_p6), %s498_s18, 64  }
  0x8a   : > { %865 = vsyncadd (%p659_p6), %s498_s18, 4294967232  ;;  %s26_s17 = sadd.s32 1, %s888_s17   ;;  %s1169_s12 = smov %s872_s13 }
  0x8b   : > { %p23_p7 = scmp.ge.s32.totalorder %s26_s17, 4   ;;  %s1170_s13 = smov %s876_s14 }
  0x8c   : > { %s1171_s14 = smov %s974_s26  ;;  %s1172_s15 = smov %s884_s16 }
  0x8d   : > { %s1173_s16 = smov %s1175_s20  ;;  %25 = sbr.rel (!%p23_p7) target bundleno = 10 (0xa), region = 107 }
  0x92   :  { %503 = vsyncpa [#allocation3], 1 }
  0x93   :  { %505 = vsyncpa [#allocation3 + $0x1], 1 }
  0x94   :  { %506 = vsyncpa [#allocation6], 1 }
  0x95   :  { %508 = vsyncpa [#allocation6 + $0x1], 1 }
  0x96   :  { %509 = vsyncpa [#allocation4], 1 }
  0x97   :  { %511 = vsyncpa [#allocation4 + $0x1], 1 }
  0x98   :  { %512 = vsyncpa [#allocation9], 1 }
  0x99   :  { %514 = vsyncpa [#allocation9 + $0x1], 1 }

</bundles_post_ra>
